<compile_context>
chip_gen: v5e
topology: v5e:2x2
jax: 0.10.0
libtpu: 0.0.40
codegen_flags: <defaults>
</compile_context>

<pallas_src>
from functools import partial

import jax
import jax.numpy as jnp
from jax.experimental import pallas as pl
from jax.experimental.pallas import tpu as pltpu


_LANE = 128


def _round_up(a, b):
    return (a + b - 1) // b * b


def _cdiv(a, b):
    return -(-a // b)


def _vmem_capacity_bytes():
    """Per-core VMEM capacity; conservative fallback = v7x's 64 MiB."""
    try:
        info = pltpu.get_tpu_info()
        cap = getattr(info, "vmem_capacity_bytes", None)
        if cap:
            return int(cap)
    except Exception:
        pass
    return 64 * 1024 * 1024


# --------------------------------------------------------------------------- #
# Kernel
# --------------------------------------------------------------------------- #
def _vae_kernel(x_ref, eps_ref,
                w_in_ref, b_in_ref,
                w_heads_ref, b_heads_ref,
                w_dh_ref, b_dh_ref,
                w_do_ref, b_do_ref,
                out_ref, *, latent_pad, out_pad):
    x = x_ref[...]

    # ----- Encoder: h = relu(x @ W_in + b_in) -----
    h = jnp.maximum(
        jnp.dot(x, w_in_ref[...], preferred_element_type=jnp.float32) + b_in_ref[...],
        0.0)

    # ----- Fused, lane-padded mean / log_var heads: one (hidden, 2*latent_pad) matmul -----
    heads = (jnp.dot(h, w_heads_ref[...], preferred_element_type=jnp.float32)
             + b_heads_ref[...])
    mean = heads[:, :latent_pad]          # vreg-aligned split (latent_pad % 128 == 0)
    log_var = heads[:, latent_pad:]

    # ----- Reparameterization: z = mean + exp(0.5 * log_var) * eps -----
    # eps padded columns are zero and W_dec_h padded rows are zero -> exact result.
    z = mean + jnp.exp(0.5 * log_var) * eps_ref[...]

    # ----- Decoder -----
    hd = jnp.maximum(
        jnp.dot(z, w_dh_ref[...], preferred_element_type=jnp.float32) + b_dh_ref[...],
        0.0)
    logits = (jnp.dot(hd, w_do_ref[...], preferred_element_type=jnp.float32)
              + b_do_ref[...])

    # ----- Fused, lane-dense output slab: [ x_hat | mean | log_var ] -----
    out_ref[:, :out_pad] = jax.nn.sigmoid(logits).astype(out_ref.dtype)
    out_ref[:, out_pad:] = heads.astype(out_ref.dtype)


# --------------------------------------------------------------------------- #
# One-time parameter repack (outside the per-call hot path)
# --------------------------------------------------------------------------- #
def prepare_params(params):
    """PyTorch layout (out, in)/(out,) -> kernel layout (in, out)/(1, out).
    Fuses mean/log_var heads (each padded to a 128-lane boundary), pads the
    decoder-output columns to a 128-lane boundary, and zero-pads W_dec_h rows
    to match. Call ONCE."""
    def wt(name):
        return jnp.asarray(params[name], jnp.float32).T        # (out,in)->(in,out)

    def bt(name):
        return jnp.asarray(params[name], jnp.float32).reshape(1, -1)

    hidden_dim, input_dim = params["w_in"].shape
    latent_dim = params["w_mean"].shape[0]
    output_dim = params["w_dec_out"].shape[0]

    latent_pad = _round_up(latent_dim, _LANE)
    out_pad = _round_up(output_dim, _LANE)

    def pad_cols(a, n):
        return jnp.pad(a, ((0, 0), (0, n - a.shape[1])))

    def pad_rows(a, n):
        return jnp.pad(a, ((0, n - a.shape[0]), (0, 0)))

    w_heads = jnp.concatenate([pad_cols(wt("w_mean"), latent_pad),
                               pad_cols(wt("w_var"), latent_pad)], axis=1)
    b_heads = jnp.concatenate([pad_cols(bt("b_mean"), latent_pad),
                               pad_cols(bt("b_var"), latent_pad)], axis=1)

    return dict(
        w_in=wt("w_in"), b_in=bt("b_in"),
        w_heads=w_heads, b_heads=b_heads,
        w_dec_h=pad_rows(wt("w_dec_h"), latent_pad), b_dec_h=bt("b_dec_h"),
        w_dec_out=pad_cols(wt("w_dec_out"), out_pad),
        b_dec_out=pad_cols(bt("b_dec_out"), out_pad),
        dims=(input_dim, hidden_dim, latent_dim, output_dim, latent_pad, out_pad),
    )


# --------------------------------------------------------------------------- #
# Wrapper
# --------------------------------------------------------------------------- #
_WEIGHT_KEYS = ("w_in", "b_in", "w_heads", "b_heads",
                "w_dec_h", "b_dec_h", "w_dec_out", "b_dec_out")


@partial(jax.jit, static_argnums=(3, 4))
def _vae_forward_jit(x, eps, kp, dims, single_buffer_weights):
    input_dim, hidden_dim, latent_dim, output_dim, latent_pad, out_pad = dims
    B = x.shape[0]
    slab = out_pad + 2 * latent_pad

    # Column-pad eps to the lane-aligned latent width (zeros -> padded z cols = 0).
    if eps.shape[1] != latent_pad:
        eps = jnp.pad(eps, ((0, 0), (0, latent_pad - eps.shape[1])))

    weight_bytes = sum(int(kp[k].size) * 4 for k in _WEIGHT_KEYS)
    weight_buf = 1 if single_buffer_weights else 2

    # ---- generation-aware batch tile, sized against actual VMEM capacity ----
    cap = _vmem_capacity_bytes()
    budget = int(0.75 * cap)                              # headroom for compiler temps
    tb_cap = 1024 if cap >= 100 * 1024 * 1024 else 512    # bigger tiles on 128 MiB parts

    TB = min(tb_cap, _round_up(B, 8))
    if B >= 16 and _cdiv(B, TB) < 2:
        TB = _round_up(_cdiv(B, 2), 8)                    # >=2 grid steps -> 2nd TC on v7x

    pipelined_cols = input_dim + latent_pad + slab        # x, eps, out (double-buffered)
    scratch_cols = 2 * hidden_dim + 2 * latent_pad        # h, hd, heads temporaries

    def tile_bytes(tb):
        return 2 * 4 * tb * pipelined_cols + 4 * tb * scratch_cols

    while TB > 8 and weight_buf * weight_bytes + tile_bytes(TB) > budget:
        TB = max(8, _round_up(TB // 2, 8))

    vmem_est = weight_buf * weight_bytes + tile_bytes(TB) + (2 << 20)
    vmem_limit = int(min(int(0.9 * cap), max(vmem_est, 16 * 1024 * 1024)))

    grid = (_cdiv(B, TB),)        # no batch pad: Pallas masks the partial last block

    def row_spec(cols):
        return pl.BlockSpec((TB, cols), lambda i: (i, 0))

    def resident(arr):            # weights stay VMEM-resident across all grid steps
        if single_buffer_weights:
            return pl.BlockSpec(arr.shape, lambda i: (0, 0),
                                pipeline_mode=pl.Buffered(1))
        return pl.BlockSpec(arr.shape, lambda i: (0, 0))

    in_specs = [row_spec(input_dim), row_spec(latent_pad)] + \
               [resident(kp[k]) for k in _WEIGHT_KEYS]

    kernel = partial(_vae_kernel, latent_pad=latent_pad, out_pad=out_pad)

    out = pl.pallas_call(
        kernel,
        out_shape=jax.ShapeDtypeStruct((B, slab), jnp.float32),
        grid_spec=pltpu.PrefetchScalarGridSpec(
            num_scalar_prefetch=0,
            grid=grid,
            in_specs=in_specs,
            out_specs=row_spec(slab),
        ),
        compiler_params=pltpu.CompilerParams(
            dimension_semantics=("parallel",),
            vmem_limit_bytes=vmem_limit,
        ),
    )(x, eps, *[kp[k] for k in _WEIGHT_KEYS])

    x_hat = out[:, :output_dim]
    mean = out[:, out_pad:out_pad + latent_dim]
    log_var = out[:, out_pad + latent_pad:out_pad + latent_pad + latent_dim]
    return x_hat, mean, log_var


def vae_forward(x, eps, kp):
    """x: (B, input_dim) f32, eps: (B, latent_dim) f32, kp: prepare_params() output."""
    dims = kp["dims"]
    arrays = {k: v for k, v in kp.items() if k != "dims"}
    try:
        return _vae_forward_jit(x, eps, arrays, dims, True)
    except Exception:
        # Fallback if this JAX build rejects single-buffered (Buffered(1)) blocks.
        return _vae_forward_jit(x, eps, arrays, dims, False)


# --------------------------------------------------------------------------- #
# Demo / self-test
# --------------------------------------------------------------------------- #
def _init_linear(key, out_features, in_features):
    """nn.Linear-style init: U(-1/sqrt(fan_in), 1/sqrt(fan_in))."""
    kw, kb = jax.random.split(key)
    bound = 1.0 / jnp.sqrt(jnp.float32(in_features))
    w = jax.random.uniform(kw, (out_features, in_features), jnp.float32, -bound, bound)
    b = jax.random.uniform(kb, (out_features,), jnp.float32, -bound, bound)
    return w, b


if __name__ == "__main__":
    batch = 8
    input_dim = 32      # decoder output_dim == input_dim (reconstruction)
    hidden_dim = 32
    latent_dim = 16

    key = jax.random.PRNGKey(0)
    k_x, k_eps, k1, k2, k3, k4, k5 = jax.random.split(key, 7)

    x = jax.random.normal(k_x, (batch, input_dim), jnp.float32)
    eps = jax.random.normal(k_eps, (batch, latent_dim), jnp.float32)  # randn_like(std)

    w_in, b_in = _init_linear(k1, hidden_dim, input_dim)
    w_mean, b_mean = _init_linear(k2, latent_dim, hidden_dim)
    w_var, b_var = _init_linear(k3, latent_dim, hidden_dim)
    w_dec_h, b_dec_h = _init_linear(k4, hidden_dim, latent_dim)
    w_dec_out, b_dec_out = _init_linear(k5, input_dim, hidden_dim)

    torch_params = dict(
        w_in=w_in, b_in=b_in,
        w_mean=w_mean, b_mean=b_mean,
        w_var=w_var, b_var=b_var,
        w_dec_h=w_dec_h, b_dec_h=b_dec_h,
        w_dec_out=w_dec_out, b_dec_out=b_dec_out,
    )

    # One-time repack to kernel layout (outside the per-call hot path).
    kernel_params = prepare_params(torch_params)
    jax.block_until_ready({k: v for k, v in kernel_params.items() if k != "dims"})

    x_hat, mean, log_var = vae_forward(x, eps, kernel_params)
    jax.block_until_ready((x_hat, mean, log_var))

    # Pure-JAX reference (PyTorch semantics).
    h = jax.nn.relu(x @ w_in.T + b_in)
    mean_ref = h @ w_mean.T + b_mean
    logvar_ref = h @ w_var.T + b_var
    z_ref = mean_ref + jnp.exp(0.5 * logvar_ref) * eps
    hd = jax.nn.relu(z_ref @ w_dec_h.T + b_dec_h)
    xhat_ref = jax.nn.sigmoid(hd @ w_dec_out.T + b_dec_out)

    assert x_hat.shape == (batch, input_dim)
    assert mean.shape == (batch, latent_dim)
    assert log_var.shape == (batch, latent_dim)
    assert jnp.allclose(x_hat, xhat_ref, atol=1e-5), "x_hat mismatch"
    assert jnp.allclose(mean, mean_ref, atol=1e-5), "mean mismatch"
    assert jnp.allclose(log_var, logvar_ref, atol=1e-5), "log_var mismatch"

    print("KERNEL_OK")
</pallas_src>

<mosaic_0001>
module attributes {stable_mosaic.version = 11 : i64} {
  func.func @_vae_kernel(%arg0: i32, %arg1: memref<8x32xf32, #tpu.memory_space<vmem>>, %arg2: memref<8x128xf32, #tpu.memory_space<vmem>>, %arg3: memref<32x32xf32, #tpu.memory_space<vmem>>, %arg4: memref<1x32xf32, #tpu.memory_space<vmem>>, %arg5: memref<32x256xf32, #tpu.memory_space<vmem>>, %arg6: memref<1x256xf32, #tpu.memory_space<vmem>>, %arg7: memref<128x32xf32, #tpu.memory_space<vmem>>, %arg8: memref<1x32xf32, #tpu.memory_space<vmem>>, %arg9: memref<32x128xf32, #tpu.memory_space<vmem>>, %arg10: memref<1x128xf32, #tpu.memory_space<vmem>>, %arg11: memref<8x384xf32, #tpu.memory_space<vmem>>) attributes {dimension_semantics = [#tpu.dimension_semantics<parallel>], iteration_bounds = array<i64: 1>, scalar_prefetch = 0 : i64, scratch_operands = 0 : i64, tpu.core_type = #tpu.core_type<tc>, window_params = [{transform_indices = @transform_0, window_bounds = array<i64: 8, 32>}, {transform_indices = @transform_1, window_bounds = array<i64: 8, 128>}, {pipeline_mode = #tpu.pipeline_mode<synchronous>, transform_indices = @transform_2, window_bounds = array<i64: 32, 32>}, {pipeline_mode = #tpu.pipeline_mode<synchronous>, transform_indices = @transform_3, window_bounds = array<i64: 1, 32>}, {pipeline_mode = #tpu.pipeline_mode<synchronous>, transform_indices = @transform_4, window_bounds = array<i64: 32, 256>}, {pipeline_mode = #tpu.pipeline_mode<synchronous>, transform_indices = @transform_5, window_bounds = array<i64: 1, 256>}, {pipeline_mode = #tpu.pipeline_mode<synchronous>, transform_indices = @transform_6, window_bounds = array<i64: 128, 32>}, {pipeline_mode = #tpu.pipeline_mode<synchronous>, transform_indices = @transform_7, window_bounds = array<i64: 1, 32>}, {pipeline_mode = #tpu.pipeline_mode<synchronous>, transform_indices = @transform_8, window_bounds = array<i64: 32, 128>}, {pipeline_mode = #tpu.pipeline_mode<synchronous>, transform_indices = @transform_9, window_bounds = array<i64: 1, 128>}, {transform_indices = @transform_10, window_bounds = array<i64: 8, 384>}]} {
    %c0 = arith.constant 0 : index
    %c0_0 = arith.constant 0 : index
    %0 = vector.load %arg1[%c0, %c0_0] : memref<8x32xf32, #tpu.memory_space<vmem>>, vector<8x32xf32>
    %c0_1 = arith.constant 0 : index
    %c0_2 = arith.constant 0 : index
    %1 = vector.load %arg3[%c0_1, %c0_2] : memref<32x32xf32, #tpu.memory_space<vmem>>, vector<32x32xf32>
    %cst = arith.constant dense<0.000000e+00> : vector<8x32xf32>
    %2 = tpu.matmul %0, %1, %cst {dimension_numbers = #tpu.dot_dimension_numbers<[1], [0], [0], [1], [0, 0, 1, 1], [], []>} : vector<8x32xf32>, vector<32x32xf32>, vector<8x32xf32> -> vector<8x32xf32>
    %c0_3 = arith.constant 0 : index
    %c0_4 = arith.constant 0 : index
    %3 = vector.load %arg4[%c0_3, %c0_4] : memref<1x32xf32, #tpu.memory_space<vmem>>, vector<1x32xf32>
    %4 = vector.broadcast %3 : vector<1x32xf32> to vector<8x32xf32>
    %5 = arith.addf %2, %4 : vector<8x32xf32>
    %cst_5 = arith.constant 0.000000e+00 : f32
    %6 = vector.broadcast %cst_5 : f32 to vector<8x32xf32>
    %7 = arith.maximumf %5, %6 : vector<8x32xf32>
    %c0_6 = arith.constant 0 : index
    %c0_7 = arith.constant 0 : index
    %8 = vector.load %arg5[%c0_6, %c0_7] : memref<32x256xf32, #tpu.memory_space<vmem>>, vector<32x256xf32>
    %cst_8 = arith.constant dense<0.000000e+00> : vector<8x256xf32>
    %9 = tpu.matmul %7, %8, %cst_8 {dimension_numbers = #tpu.dot_dimension_numbers<[1], [0], [0], [1], [0, 0, 1, 1], [], []>} : vector<8x32xf32>, vector<32x256xf32>, vector<8x256xf32> -> vector<8x256xf32>
    %c0_9 = arith.constant 0 : index
    %c0_10 = arith.constant 0 : index
    %10 = vector.load %arg6[%c0_9, %c0_10] : memref<1x256xf32, #tpu.memory_space<vmem>>, vector<1x256xf32>
    %11 = vector.broadcast %10 : vector<1x256xf32> to vector<8x256xf32>
    %12 = arith.addf %9, %11 : vector<8x256xf32>
    %13 = vector.extract_strided_slice %12 {offsets = [0, 0], sizes = [8, 128], strides = [1, 1]} : vector<8x256xf32> to vector<8x128xf32>
    %14 = vector.extract_strided_slice %12 {offsets = [0, 128], sizes = [8, 128], strides = [1, 1]} : vector<8x256xf32> to vector<8x128xf32>
    %cst_11 = arith.constant 5.000000e-01 : f32
    %15 = vector.broadcast %cst_11 : f32 to vector<8x128xf32>
    %16 = arith.mulf %15, %14 : vector<8x128xf32>
    %17 = math.exp %16 : vector<8x128xf32>
    %c0_12 = arith.constant 0 : index
    %c0_13 = arith.constant 0 : index
    %18 = vector.load %arg2[%c0_12, %c0_13] : memref<8x128xf32, #tpu.memory_space<vmem>>, vector<8x128xf32>
    %19 = arith.mulf %17, %18 : vector<8x128xf32>
    %20 = arith.addf %13, %19 : vector<8x128xf32>
    %c0_14 = arith.constant 0 : index
    %c0_15 = arith.constant 0 : index
    %21 = vector.load %arg7[%c0_14, %c0_15] : memref<128x32xf32, #tpu.memory_space<vmem>>, vector<128x32xf32>
    %cst_16 = arith.constant dense<0.000000e+00> : vector<8x32xf32>
    %22 = tpu.matmul %20, %21, %cst_16 {dimension_numbers = #tpu.dot_dimension_numbers<[1], [0], [0], [1], [0, 0, 1, 1], [], []>} : vector<8x128xf32>, vector<128x32xf32>, vector<8x32xf32> -> vector<8x32xf32>
    %c0_17 = arith.constant 0 : index
    %c0_18 = arith.constant 0 : index
    %23 = vector.load %arg8[%c0_17, %c0_18] : memref<1x32xf32, #tpu.memory_space<vmem>>, vector<1x32xf32>
    %24 = vector.broadcast %23 : vector<1x32xf32> to vector<8x32xf32>
    %25 = arith.addf %22, %24 : vector<8x32xf32>
    %cst_19 = arith.constant 0.000000e+00 : f32
    %26 = vector.broadcast %cst_19 : f32 to vector<8x32xf32>
    %27 = arith.maximumf %25, %26 : vector<8x32xf32>
    %c0_20 = arith.constant 0 : index
    %c0_21 = arith.constant 0 : index
    %28 = vector.load %arg9[%c0_20, %c0_21] : memref<32x128xf32, #tpu.memory_space<vmem>>, vector<32x128xf32>
    %cst_22 = arith.constant dense<0.000000e+00> : vector<8x128xf32>
    %29 = tpu.matmul %27, %28, %cst_22 {dimension_numbers = #tpu.dot_dimension_numbers<[1], [0], [0], [1], [0, 0, 1, 1], [], []>} : vector<8x32xf32>, vector<32x128xf32>, vector<8x128xf32> -> vector<8x128xf32>
    %c0_23 = arith.constant 0 : index
    %c0_24 = arith.constant 0 : index
    %30 = vector.load %arg10[%c0_23, %c0_24] : memref<1x128xf32, #tpu.memory_space<vmem>>, vector<1x128xf32>
    %31 = vector.broadcast %30 : vector<1x128xf32> to vector<8x128xf32>
    %32 = arith.addf %29, %31 : vector<8x128xf32>
    %33 = arith.negf %32 : vector<8x128xf32>
    %34 = math.exp %33 : vector<8x128xf32>
    %cst_25 = arith.constant 1.000000e+00 : f32
    %35 = vector.broadcast %cst_25 : f32 to vector<8x128xf32>
    %36 = arith.addf %35, %34 : vector<8x128xf32>
    %37 = arith.divf %35, %36 : vector<8x128xf32>
    %c0_26 = arith.constant 0 : index
    %c0_27 = arith.constant 0 : index
    %38 = vector.load %arg11[%c0_26, %c0_27] : memref<8x384xf32, #tpu.memory_space<vmem>>, vector<8x128xf32>
    tpu.vector_store %arg11[%c0_26, %c0_27], %37 {strides = array<i32>} : memref<8x384xf32, #tpu.memory_space<vmem>>, vector<8x128xf32>,
    %c0_28 = arith.constant 0 : index
    %c128 = arith.constant 128 : index
    %39 = vector.load %arg11[%c0_28, %c128] : memref<8x384xf32, #tpu.memory_space<vmem>>, vector<8x256xf32>
    tpu.vector_store %arg11[%c0_28, %c128], %12 {strides = array<i32>} : memref<8x384xf32, #tpu.memory_space<vmem>>, vector<8x256xf32>,
    return
  }
  func.func @transform_0(%arg0: i32) -> (i32, i32) {
    %c0_i32 = arith.constant 0 : i32
    %c0_i32_0 = arith.constant 0 : i32
    return %arg0, %c0_i32 : i32, i32
  }
  func.func @transform_1(%arg0: i32) -> (i32, i32) {
    %c0_i32 = arith.constant 0 : i32
    %c0_i32_0 = arith.constant 0 : i32
    return %arg0, %c0_i32 : i32, i32
  }
  func.func @transform_2(%arg0: i32) -> (i32, i32) {
    %c0_i32 = arith.constant 0 : i32
    %c0_i32_0 = arith.constant 0 : i32
    %c0_i32_1 = arith.constant 0 : i32
    return %c0_i32, %c0_i32_0 : i32, i32
  }
  func.func @transform_3(%arg0: i32) -> (i32, i32) {
    %c0_i32 = arith.constant 0 : i32
    %c0_i32_0 = arith.constant 0 : i32
    %c0_i32_1 = arith.constant 0 : i32
    return %c0_i32, %c0_i32_0 : i32, i32
  }
  func.func @transform_4(%arg0: i32) -> (i32, i32) {
    %c0_i32 = arith.constant 0 : i32
    %c0_i32_0 = arith.constant 0 : i32
    %c0_i32_1 = arith.constant 0 : i32
    return %c0_i32, %c0_i32_0 : i32, i32
  }
  func.func @transform_5(%arg0: i32) -> (i32, i32) {
    %c0_i32 = arith.constant 0 : i32
    %c0_i32_0 = arith.constant 0 : i32
    %c0_i32_1 = arith.constant 0 : i32
    return %c0_i32, %c0_i32_0 : i32, i32
  }
  func.func @transform_6(%arg0: i32) -> (i32, i32) {
    %c0_i32 = arith.constant 0 : i32
    %c0_i32_0 = arith.constant 0 : i32
    %c0_i32_1 = arith.constant 0 : i32
    return %c0_i32, %c0_i32_0 : i32, i32
  }
  func.func @transform_7(%arg0: i32) -> (i32, i32) {
    %c0_i32 = arith.constant 0 : i32
    %c0_i32_0 = arith.constant 0 : i32
    %c0_i32_1 = arith.constant 0 : i32
    return %c0_i32, %c0_i32_0 : i32, i32
  }
  func.func @transform_8(%arg0: i32) -> (i32, i32) {
    %c0_i32 = arith.constant 0 : i32
    %c0_i32_0 = arith.constant 0 : i32
    %c0_i32_1 = arith.constant 0 : i32
    return %c0_i32, %c0_i32_0 : i32, i32
  }
  func.func @transform_9(%arg0: i32) -> (i32, i32) {
    %c0_i32 = arith.constant 0 : i32
    %c0_i32_0 = arith.constant 0 : i32
    %c0_i32_1 = arith.constant 0 : i32
    return %c0_i32, %c0_i32_0 : i32, i32
  }
  func.func @transform_10(%arg0: i32) -> (i32, i32) {
    %c0_i32 = arith.constant 0 : i32
    %c0_i32_0 = arith.constant 0 : i32
    return %arg0, %c0_i32 : i32, i32
  }
}

module attributes {stable_mosaic.version = 11 : i64} {
  func.func @_vae_kernel(%arg0: i32, %arg1: memref<8x32xf32, #tpu.memory_space<vmem>>, %arg2: memref<8x128xf32, #tpu.memory_space<vmem>>, %arg3: memref<32x32xf32, #tpu.memory_space<vmem>>, %arg4: memref<1x32xf32, #tpu.memory_space<vmem>>, %arg5: memref<32x256xf32, #tpu.memory_space<vmem>>, %arg6: memref<1x256xf32, #tpu.memory_space<vmem>>, %arg7: memref<128x32xf32, #tpu.memory_space<vmem>>, %arg8: memref<1x32xf32, #tpu.memory_space<vmem>>, %arg9: memref<32x128xf32, #tpu.memory_space<vmem>>, %arg10: memref<1x128xf32, #tpu.memory_space<vmem>>, %arg11: memref<8x384xf32, #tpu.memory_space<vmem>>) attributes {dimension_semantics = [#tpu.dimension_semantics<parallel>], iteration_bounds = array<i64: 1>, scalar_prefetch = 0 : i64, scratch_operands = 0 : i64, tpu.core_type = #tpu.core_type<tc>, window_params = [{transform_indices = @transform_0, window_bounds = array<i64: 8, 32>}, {transform_indices = @transform_1, window_bounds = array<i64: 8, 128>}, {pipeline_mode = #tpu.pipeline_mode<synchronous>, transform_indices = @transform_2, window_bounds = array<i64: 32, 32>}, {pipeline_mode = #tpu.pipeline_mode<synchronous>, transform_indices = @transform_3, window_bounds = array<i64: 1, 32>}, {pipeline_mode = #tpu.pipeline_mode<synchronous>, transform_indices = @transform_4, window_bounds = array<i64: 32, 256>}, {pipeline_mode = #tpu.pipeline_mode<synchronous>, transform_indices = @transform_5, window_bounds = array<i64: 1, 256>}, {pipeline_mode = #tpu.pipeline_mode<synchronous>, transform_indices = @transform_6, window_bounds = array<i64: 128, 32>}, {pipeline_mode = #tpu.pipeline_mode<synchronous>, transform_indices = @transform_7, window_bounds = array<i64: 1, 32>}, {pipeline_mode = #tpu.pipeline_mode<synchronous>, transform_indices = @transform_8, window_bounds = array<i64: 32, 128>}, {pipeline_mode = #tpu.pipeline_mode<synchronous>, transform_indices = @transform_9, window_bounds = array<i64: 1, 128>}, {transform_indices = @transform_10, window_bounds = array<i64: 8, 384>}]} {
    %c0 = arith.constant 0 : index
    %c0_0 = arith.constant 0 : index
    %0 = vector.load %arg1[%c0, %c0_0] : memref<8x32xf32, #tpu.memory_space<vmem>>, vector<8x32xf32>
    %c0_1 = arith.constant 0 : index
    %c0_2 = arith.constant 0 : index
    %1 = vector.load %arg3[%c0_1, %c0_2] : memref<32x32xf32, #tpu.memory_space<vmem>>, vector<32x32xf32>
    %cst = arith.constant dense<0.000000e+00> : vector<8x32xf32>
    %2 = tpu.matmul %0, %1, %cst {dimension_numbers = #tpu.dot_dimension_numbers<[1], [0], [0], [1], [0, 0, 1, 1], [], []>} : vector<8x32xf32>, vector<32x32xf32>, vector<8x32xf32> -> vector<8x32xf32>
    %c0_3 = arith.constant 0 : index
    %c0_4 = arith.constant 0 : index
    %3 = vector.load %arg4[%c0_3, %c0_4] : memref<1x32xf32, #tpu.memory_space<vmem>>, vector<1x32xf32>
    %4 = vector.broadcast %3 : vector<1x32xf32> to vector<8x32xf32>
    %5 = arith.addf %2, %4 : vector<8x32xf32>
    %cst_5 = arith.constant 0.000000e+00 : f32
    %6 = vector.broadcast %cst_5 : f32 to vector<8x32xf32>
    %7 = arith.maximumf %5, %6 : vector<8x32xf32>
    %c0_6 = arith.constant 0 : index
    %c0_7 = arith.constant 0 : index
    %8 = vector.load %arg5[%c0_6, %c0_7] : memref<32x256xf32, #tpu.memory_space<vmem>>, vector<32x256xf32>
    %cst_8 = arith.constant dense<0.000000e+00> : vector<8x256xf32>
    %9 = tpu.matmul %7, %8, %cst_8 {dimension_numbers = #tpu.dot_dimension_numbers<[1], [0], [0], [1], [0, 0, 1, 1], [], []>} : vector<8x32xf32>, vector<32x256xf32>, vector<8x256xf32> -> vector<8x256xf32>
    %c0_9 = arith.constant 0 : index
    %c0_10 = arith.constant 0 : index
    %10 = vector.load %arg6[%c0_9, %c0_10] : memref<1x256xf32, #tpu.memory_space<vmem>>, vector<1x256xf32>
    %11 = vector.broadcast %10 : vector<1x256xf32> to vector<8x256xf32>
    %12 = arith.addf %9, %11 : vector<8x256xf32>
    %13 = vector.extract_strided_slice %12 {offsets = [0, 0], sizes = [8, 128], strides = [1, 1]} : vector<8x256xf32> to vector<8x128xf32>
    %14 = vector.extract_strided_slice %12 {offsets = [0, 128], sizes = [8, 128], strides = [1, 1]} : vector<8x256xf32> to vector<8x128xf32>
    %cst_11 = arith.constant 5.000000e-01 : f32
    %15 = vector.broadcast %cst_11 : f32 to vector<8x128xf32>
    %16 = arith.mulf %15, %14 : vector<8x128xf32>
    %17 = math.exp %16 : vector<8x128xf32>
    %c0_12 = arith.constant 0 : index
    %c0_13 = arith.constant 0 : index
    %18 = vector.load %arg2[%c0_12, %c0_13] : memref<8x128xf32, #tpu.memory_space<vmem>>, vector<8x128xf32>
    %19 = arith.mulf %17, %18 : vector<8x128xf32>
    %20 = arith.addf %13, %19 : vector<8x128xf32>
    %c0_14 = arith.constant 0 : index
    %c0_15 = arith.constant 0 : index
    %21 = vector.load %arg7[%c0_14, %c0_15] : memref<128x32xf32, #tpu.memory_space<vmem>>, vector<128x32xf32>
    %cst_16 = arith.constant dense<0.000000e+00> : vector<8x32xf32>
    %22 = tpu.matmul %20, %21, %cst_16 {dimension_numbers = #tpu.dot_dimension_numbers<[1], [0], [0], [1], [0, 0, 1, 1], [], []>} : vector<8x128xf32>, vector<128x32xf32>, vector<8x32xf32> -> vector<8x32xf32>
    %c0_17 = arith.constant 0 : index
    %c0_18 = arith.constant 0 : index
    %23 = vector.load %arg8[%c0_17, %c0_18] : memref<1x32xf32, #tpu.memory_space<vmem>>, vector<1x32xf32>
    %24 = vector.broadcast %23 : vector<1x32xf32> to vector<8x32xf32>
    %25 = arith.addf %22, %24 : vector<8x32xf32>
    %cst_19 = arith.constant 0.000000e+00 : f32
    %26 = vector.broadcast %cst_19 : f32 to vector<8x32xf32>
    %27 = arith.maximumf %25, %26 : vector<8x32xf32>
    %c0_20 = arith.constant 0 : index
    %c0_21 = arith.constant 0 : index
    %28 = vector.load %arg9[%c0_20, %c0_21] : memref<32x128xf32, #tpu.memory_space<vmem>>, vector<32x128xf32>
    %cst_22 = arith.constant dense<0.000000e+00> : vector<8x128xf32>
    %29 = tpu.matmul %27, %28, %cst_22 {dimension_numbers = #tpu.dot_dimension_numbers<[1], [0], [0], [1], [0, 0, 1, 1], [], []>} : vector<8x32xf32>, vector<32x128xf32>, vector<8x128xf32> -> vector<8x128xf32>
    %c0_23 = arith.constant 0 : index
    %c0_24 = arith.constant 0 : index
    %30 = vector.load %arg10[%c0_23, %c0_24] : memref<1x128xf32, #tpu.memory_space<vmem>>, vector<1x128xf32>
    %31 = vector.broadcast %30 : vector<1x128xf32> to vector<8x128xf32>
    %32 = arith.addf %29, %31 : vector<8x128xf32>
    %33 = arith.negf %32 : vector<8x128xf32>
    %34 = math.exp %33 : vector<8x128xf32>
    %cst_25 = arith.constant 1.000000e+00 : f32
    %35 = vector.broadcast %cst_25 : f32 to vector<8x128xf32>
    %36 = arith.addf %35, %34 : vector<8x128xf32>
    %37 = arith.divf %35, %36 : vector<8x128xf32>
    %c0_26 = arith.constant 0 : index
    %c0_27 = arith.constant 0 : index
    %38 = vector.load %arg11[%c0_26, %c0_27] : memref<8x384xf32, #tpu.memory_space<vmem>>, vector<8x128xf32>
    tpu.vector_store %arg11[%c0_26, %c0_27], %37 {strides = array<i32>} : memref<8x384xf32, #tpu.memory_space<vmem>>, vector<8x128xf32>,
    %c0_28 = arith.constant 0 : index
    %c128 = arith.constant 128 : index
    %39 = vector.load %arg11[%c0_28, %c128] : memref<8x384xf32, #tpu.memory_space<vmem>>, vector<8x256xf32>
    tpu.vector_store %arg11[%c0_28, %c128], %12 {strides = array<i32>} : memref<8x384xf32, #tpu.memory_space<vmem>>, vector<8x256xf32>,
    return
  }
  func.func @transform_0(%arg0: i32) -> (i32, i32) {
    %c0_i32 = arith.constant 0 : i32
    %c0_i32_0 = arith.constant 0 : i32
    return %arg0, %c0_i32 : i32, i32
  }
  func.func @transform_1(%arg0: i32) -> (i32, i32) {
    %c0_i32 = arith.constant 0 : i32
    %c0_i32_0 = arith.constant 0 : i32
    return %arg0, %c0_i32 : i32, i32
  }
  func.func @transform_2(%arg0: i32) -> (i32, i32) {
    %c0_i32 = arith.constant 0 : i32
    %c0_i32_0 = arith.constant 0 : i32
    %c0_i32_1 = arith.constant 0 : i32
    return %c0_i32, %c0_i32_0 : i32, i32
  }
  func.func @transform_3(%arg0: i32) -> (i32, i32) {
    %c0_i32 = arith.constant 0 : i32
    %c0_i32_0 = arith.constant 0 : i32
    %c0_i32_1 = arith.constant 0 : i32
    return %c0_i32, %c0_i32_0 : i32, i32
  }
  func.func @transform_4(%arg0: i32) -> (i32, i32) {
    %c0_i32 = arith.constant 0 : i32
    %c0_i32_0 = arith.constant 0 : i32
    %c0_i32_1 = arith.constant 0 : i32
    return %c0_i32, %c0_i32_0 : i32, i32
  }
  func.func @transform_5(%arg0: i32) -> (i32, i32) {
    %c0_i32 = arith.constant 0 : i32
    %c0_i32_0 = arith.constant 0 : i32
    %c0_i32_1 = arith.constant 0 : i32
    return %c0_i32, %c0_i32_0 : i32, i32
  }
  func.func @transform_6(%arg0: i32) -> (i32, i32) {
    %c0_i32 = arith.constant 0 : i32
    %c0_i32_0 = arith.constant 0 : i32
    %c0_i32_1 = arith.constant 0 : i32
    return %c0_i32, %c0_i32_0 : i32, i32
  }
  func.func @transform_7(%arg0: i32) -> (i32, i32) {
    %c0_i32 = arith.constant 0 : i32
    %c0_i32_0 = arith.constant 0 : i32
    %c0_i32_1 = arith.constant 0 : i32
    return %c0_i32, %c0_i32_0 : i32, i32
  }
  func.func @transform_8(%arg0: i32) -> (i32, i32) {
    %c0_i32 = arith.constant 0 : i32
    %c0_i32_0 = arith.constant 0 : i32
    %c0_i32_1 = arith.constant 0 : i32
    return %c0_i32, %c0_i32_0 : i32, i32
  }
  func.func @transform_9(%arg0: i32) -> (i32, i32) {
    %c0_i32 = arith.constant 0 : i32
    %c0_i32_0 = arith.constant 0 : i32
    %c0_i32_1 = arith.constant 0 : i32
    return %c0_i32, %c0_i32_0 : i32, i32
  }
  func.func @transform_10(%arg0: i32) -> (i32, i32) {
    %c0_i32 = arith.constant 0 : i32
    %c0_i32_0 = arith.constant 0 : i32
    return %arg0, %c0_i32 : i32, i32
  }
}

</mosaic_0001>

<bundles_post_ra>
// kernel: _vae_forward_jit.1
= control target key start
LH: loop header
LB: loop body
LE: loop exit
PB: predicated region body
PF: predicated region fallthrough
CT: control target
= control target key end

     0   :  { %vm44_vm0 = vcmask 261120   ;;  %s426_s2 = inlined_call_operand.vmem [shape: f32[32,32], index: 2, kind: input, shape index: {}]   ;;  %s427_s4 = inlined_call_operand.vmem [shape: f32[32,256], index: 4, kind: input, shape index: {}]   ;;  %s428_s3 = inlined_call_operand.vmem [shape: f32[1,32], index: 3, kind: input, shape index: {}]   ;;  %s429_s0 = inlined_call_operand.vmem [shape: f32[8,32], index: 0, kind: input, shape index: {}]   ;;  %s430_s6 = inlined_call_operand.vmem [shape: f32[128,32], index: 6, kind: input, shape index: {}]   ;;  %s431_s7 = inlined_call_operand.vmem [shape: f32[1,32], index: 7, kind: input, shape index: {}]   ;;  %s432_s8 = inlined_call_operand.vmem [shape: f32[32,128], index: 8, kind: input, shape index: {}]   ;;  %s433_s5 = inlined_call_operand.vmem [shape: f32[1,256], index: 5, kind: input, shape index: {}]   ;;  %s434_s10 = inlined_call_operand.vmem [shape: f32[8,384], index: 10, kind: output, shape index: {}]   ;;  %s435_s1 = inlined_call_operand.vmem [shape: f32[8,128], index: 1, kind: input, shape index: {}]   ;;  %s436_s9 = inlined_call_operand.vmem [shape: f32[1,128], index: 9, kind: input, shape index: {}]  }
   0x1   :  { %v39_v0 = vld [vmem:[%s426_s2 + $0x18] sm:$0xff]  ;;  %v38_v1 = vld [vmem:[%s426_s2 + $0x10] sm:$0xff]  ;;  %v37_v3 = vld [vmem:[%s426_s2 + $0x8] sm:$0xff] }
   0x2   :  { %60 = vmatpush.msra.mxu0 %v39_v0  ;;  %v75_v2 = vld [vmem:[%s427_s4 + $0x30] sm:$0xff]  ;;  %v76_v4 = vld [vmem:[%s427_s4 + $0x38] sm:$0xff]  ;;  %v36_v5 = vld [vmem:[%s426_s2] sm:$0xff] }
   0x3   :  { %98 = vmatpush.msra.mxu1 %v75_v2  ;;  %118 = vmatpush.msra.mxu2 %v76_v4  ;;  %v35_v6 = vld [vmem:[%s429_s0] sm:$0xff]  ;;  %v74_v8 = vld [vmem:[%s427_s4 + $0x28] sm:$0xff]  ;;  %v71_v9 = vld [vmem:[%s427_s4 + $0x10] sm:$0xff] }
   0x4   :  { %61 = vmatpush.msra.mxu0 %v38_v1  ;;  %v73_v7 = vld [vmem:[%s427_s4 + $0x20] sm:$0xff]  ;;  %v72_v10 = vld [vmem:[%s427_s4 + $0x18] sm:$0xff]  ;;  %v70_v12 = vld [vmem:[%s427_s4 + $0x8] sm:$0xff] }
   0x5   :  { %99 = vmatpush.msra.mxu1 %v73_v7  ;;  %119 = vmatpush.msra.mxu2 %v74_v8  ;;  %v69_v11 = vld [vmem:[%s427_s4] sm:$0xff]  ;;  %v147_v13 = vld [vmem:[%s430_s6 + $0x78] sm:$0xff]  ;;  %v146_v14 = vld [vmem:[%s430_s6 + $0x70] sm:$0xff] }
   0x6   :  { %62 = vmatpush.msra.mxu0 %v37_v3  ;;  %152 = vmatpush.msra.mxu3 %v147_v13  ;;  %v145_v15 = vld [vmem:[%s430_s6 + $0x68] sm:$0xff]  ;;  %v144_v16 = vld [vmem:[%s430_s6 + $0x60] sm:$0xff]  ;;  %v143_v21 = vld [vmem:[%s430_s6 + $0x58] sm:$0xff] }
   0x7   :  { %100 = vmatpush.msra.mxu1 %v71_v9  ;;  %120 = vmatpush.msra.mxu2 %v72_v10  ;;  %v235_v17 = vld [vmem:[%s428_s3] ss:$0 sm:$0xff]  ;;  %v142_v22 = vld [vmem:[%s430_s6 + $0x50] sm:$0xff]  ;;  %v141_v23 = vld [vmem:[%s430_s6 + $0x48] sm:$0xff] }
   0x8   :  { %63 = vmatpush.msra.mxu0 %v36_v5  ;;  %153 = vmatpush.msra.mxu3 %v146_v14  ;;  %v140_v24 = vld [vmem:[%s430_s6 + $0x40] sm:$0xff]  ;;  %v139_v25 = vld [vmem:[%s430_s6 + $0x38] sm:$0xff]  ;;  %v138_v26 = vld [vmem:[%s430_s6 + $0x30] sm:$0xff] }
   0x9   :  { %230 = vmatmul.msk.f32.vlgmr.msra.gmra.mxu0 %vm44_vm0, %v35_v6  ;;  %101 = vmatpush.msra.mxu1 %v69_v11  ;;  %v137_v27 = vld [vmem:[%s430_s6 + $0x28] sm:$0xff]  ;;  %v136_v28 = vld [vmem:[%s430_s6 + $0x20] sm:$0xff]  ;;  %v135_v29 = vld [vmem:[%s430_s6 + $0x18] sm:$0xff] }
   0xa   :  { %121 = vmatpush.msra.mxu2 %v70_v12  ;;  %154 = vmatpush.msra.mxu3 %v145_v15  ;;  %v134_v30 = vld [vmem:[%s430_s6 + $0x10] sm:$0xff]  ;;  %v133_v31 = vld [vmem:[%s430_s6 + $0x8] sm:$0xff]  ;;  %v132_v32 = vld [vmem:[%s430_s6] sm:$0xff] }
   0xb   :  { %v176_v33 = vld [vmem:[%s432_s8 + $0x18] sm:$0xff]  ;;  %v175_v34 = vld [vmem:[%s432_s8 + $0x10] sm:$0xff]  ;;  %v77_v35 = vld [vmem:[%s433_s5] sm:$0x3] }
   0xc   :  { %155 = vmatpush.msra.mxu3 %v144_v16  ;;  %196 = vmatpush.msrb.mxu0 %v176_v33  ;;  %v79_v36 = vperm.slane %v77_v35, 0  ;;  %v80_v39 = vperm.slane %v77_v35, 1  ;;  %v129_v44 = vld [vmem:[%s435_s1] sm:$0xff]  ;;  %v174_v48 = vld [vmem:[%s432_s8 + $0x8] sm:$0xff] }
   0xd   :  { %v173_v49 = vld [vmem:[%s432_s8] sm:$0xff] }
   0xe   :  { %156 = vmatpush.msra.mxu3 %v143_v21  ;;  %197 = vmatpush.msrb.mxu0 %v175_v34  ;;  %v236_v50 = vld [vmem:[%s431_s7] ss:$0 sm:$0xff] }
   0xf   :  { %v237_v54 = vld [vmem:[%s436_s9] ss:$0 sm:$0xff] }
  0x10   :  { %157 = vmatpush.msra.mxu3 %v142_v22  ;;  %198 = vmatpush.msrb.mxu0 %v174_v48 }
  0x12   :  { %158 = vmatpush.msra.mxu3 %v141_v23  ;;  %199 = vmatpush.msrb.mxu0 %v173_v49 }
  0x14   :  { %159 = vmatpush.msra.mxu3 %v140_v24 }
  0x16   :  { %160 = vmatpush.msra.mxu3 %v139_v25 }
  0x18   :  { %161 = vmatpush.msra.mxu3 %v138_v26 }
  0x1a   :  { %162 = vmatpush.msra.mxu3 %v137_v27 }
  0x1c   :  { %163 = vmatpush.msra.mxu3 %v136_v28 }
  0x1e   :  { %164 = vmatpush.msra.mxu3 %v135_v29 }
  0x20   :  { %165 = vmatpush.msra.mxu3 %v134_v30 }
  0x22   :  { %166 = vmatpush.msra.mxu3 %v133_v31 }
  0x24   :  { %167 = vmatpush.msra.mxu3 %v132_v32 }
  0x86   :  { %v65_v18 = vpop.f32.mrf.mxu0 }
  0x87   :  { %v66_v19 = vadd.f32 %v235_v17, %v65_v18 }
  0x89   :  { %v68_v20 = vmax.f32 %v66_v19, 0.0 }
  0x8b   :  { %231 = vmatmul.msk.f32.vlgmr.msra.gmra.mxu1 %vm44_vm0, %v68_v20  ;;  %232 = vmatmul.msk.f32.vlgmr.msra.gmra.mxu2 %vm44_vm0, %v68_v20 }
 0x108   :  { %v103_v37 = vpop.f32.mrf.mxu1 }
 0x109   :  { %v104_v38 = vadd.f32 %v103_v37, %v79_v36 }
 0x10b   :  { %224 = vst [vmem:[%s434_s10 + $0x8] sm:$0xff] %v104_v38 }
 0x10e   :  { %v123_v40 = vpop.f32.mrf.mxu2 }
 0x10f   :  { %v124_v41 = vadd.f32 %v123_v40, %v80_v39 }
 0x111   :  { %v126_v42 = vmul.f32 0.5, %v124_v41  ;;  %225 = vst [vmem:[%s434_s10 + $0x10] sm:$0xff] %v124_v41 }
 0x113   :  { %v127_v43 = vmul.f32 1.442695, %v126_v42 }
 0x115   :  { %238 = vpow2.f32 %v127_v43 }
 0x11b   :  { %v239_v45 = vpop.eup %238 }
 0x11c   :  { %v130_v46 = vmul.f32 %v239_v45, %v129_v44 }
 0x11e   :  { %v131_v47 = vadd.f32 %v130_v46, %v104_v38 }
 0x120   :  { %168 = vmatmul.f32.vlgmr.msra.gmra.mxu3 %v131_v47 }
 0x1a3   :  { %v169_v51 = vpop.f32.mrf.mxu3 }
 0x1a4   :  { %v170_v52 = vadd.f32 %v236_v50, %v169_v51 }
 0x1a6   :  { %v172_v53 = vmax.f32 %v170_v52, 0.0 }
 0x1a8   :  { %233 = vmatmul.msk.f32.vlgmr.msrb.gmra.mxu0 %vm44_vm0, %v172_v53 }
 0x225   :  { %v201_v55 = vpop.f32.mrf.mxu0 }
 0x226   :  { %v202_v56 = vadd.f32 %v237_v54, %v201_v55 }
 0x228   :  { %v234_v57 = vmul.f32 -1.442695, %v202_v56 }
 0x22a   :  { %240 = vpow2.f32 %v234_v57 }
 0x230   :  { %v241_v58 = vpop.eup %240 }
 0x231   :  { %v207_v59 = vadd.f32 1.0, %v241_v58 }
 0x233   :  { %242 = vrcp.f32 %v207_v59  ;;  %v219_v63 = vand.u32 2147483648, %v207_v59  ;;  %v217_v1 = vand.u32 2147483647, %v207_v59  ;;  %vm213_vm2 = vweird.f32 %v207_v59 }
 0x235   :  { %v220_v3 = vor.u32 1.1754944e-38, %v219_v63  ;;  %vm218_vm4 = vcmp.eq.f32.partialorder %v217_v1, 8.507059e+37 }
 0x239   :  { %v243_v60 = vpop.eup %242 }
 0x23a   :  { %v209_v61 = vmul.f32 %v243_v60, %v207_v59  ;;  %vm214_vm1 = vweird.f32 %v243_v60 }
 0x23b   :  { %vm215_vm3 = vmor %vm213_vm2, %vm214_vm1 }
 0x23c   :  { %v210_v62 = vsub.f32 1.0, %v209_v61 }
 0x23e   :  { %v211_v0 = vmul.f32 %v243_v60, %v210_v62 }
 0x240   :  { %v212_v2 = vadd.f32 %v243_v60, %v211_v0 }
 0x242   :  { %v216_v4 = vsel %vm215_vm3, %v243_v60, %v212_v2 }
 0x243   :  { %v221_v5 = vsel %vm218_vm4, %v220_v3, %v216_v4 }
 0x244   :  { %223 = vst [vmem:[%s434_s10] sm:$0xff] %v221_v5 }

// kernel: _vae_forward_jit.1
= control target key start
LH: loop header
LB: loop body
LE: loop exit
PB: predicated region body
PF: predicated region fallthrough
CT: control target
= control target key end

     0   :  { %vm44_vm0 = vcmask 261120   ;;  %s426_s2 = inlined_call_operand.vmem [shape: f32[32,32], index: 2, kind: input, shape index: {}]   ;;  %s427_s4 = inlined_call_operand.vmem [shape: f32[32,256], index: 4, kind: input, shape index: {}]   ;;  %s428_s3 = inlined_call_operand.vmem [shape: f32[1,32], index: 3, kind: input, shape index: {}]   ;;  %s429_s0 = inlined_call_operand.vmem [shape: f32[8,32], index: 0, kind: input, shape index: {}]   ;;  %s430_s6 = inlined_call_operand.vmem [shape: f32[128,32], index: 6, kind: input, shape index: {}]   ;;  %s431_s7 = inlined_call_operand.vmem [shape: f32[1,32], index: 7, kind: input, shape index: {}]   ;;  %s432_s8 = inlined_call_operand.vmem [shape: f32[32,128], index: 8, kind: input, shape index: {}]   ;;  %s433_s5 = inlined_call_operand.vmem [shape: f32[1,256], index: 5, kind: input, shape index: {}]   ;;  %s434_s10 = inlined_call_operand.vmem [shape: f32[8,384], index: 10, kind: output, shape index: {}]   ;;  %s435_s1 = inlined_call_operand.vmem [shape: f32[8,128], index: 1, kind: input, shape index: {}]   ;;  %s436_s9 = inlined_call_operand.vmem [shape: f32[1,128], index: 9, kind: input, shape index: {}]  }
   0x1   :  { %v39_v0 = vld [vmem:[%s426_s2 + $0x18] sm:$0xff]  ;;  %v38_v1 = vld [vmem:[%s426_s2 + $0x10] sm:$0xff]  ;;  %v37_v3 = vld [vmem:[%s426_s2 + $0x8] sm:$0xff] }
   0x2   :  { %60 = vmatpush.msra.mxu0 %v39_v0  ;;  %v75_v2 = vld [vmem:[%s427_s4 + $0x30] sm:$0xff]  ;;  %v76_v4 = vld [vmem:[%s427_s4 + $0x38] sm:$0xff]  ;;  %v36_v5 = vld [vmem:[%s426_s2] sm:$0xff] }
   0x3   :  { %98 = vmatpush.msra.mxu1 %v75_v2  ;;  %118 = vmatpush.msra.mxu2 %v76_v4  ;;  %v35_v6 = vld [vmem:[%s429_s0] sm:$0xff]  ;;  %v74_v8 = vld [vmem:[%s427_s4 + $0x28] sm:$0xff]  ;;  %v71_v9 = vld [vmem:[%s427_s4 + $0x10] sm:$0xff] }
   0x4   :  { %61 = vmatpush.msra.mxu0 %v38_v1  ;;  %v73_v7 = vld [vmem:[%s427_s4 + $0x20] sm:$0xff]  ;;  %v72_v10 = vld [vmem:[%s427_s4 + $0x18] sm:$0xff]  ;;  %v70_v12 = vld [vmem:[%s427_s4 + $0x8] sm:$0xff] }
   0x5   :  { %99 = vmatpush.msra.mxu1 %v73_v7  ;;  %119 = vmatpush.msra.mxu2 %v74_v8  ;;  %v69_v11 = vld [vmem:[%s427_s4] sm:$0xff]  ;;  %v147_v13 = vld [vmem:[%s430_s6 + $0x78] sm:$0xff]  ;;  %v146_v14 = vld [vmem:[%s430_s6 + $0x70] sm:$0xff] }
   0x6   :  { %62 = vmatpush.msra.mxu0 %v37_v3  ;;  %152 = vmatpush.msra.mxu3 %v147_v13  ;;  %v145_v15 = vld [vmem:[%s430_s6 + $0x68] sm:$0xff]  ;;  %v144_v16 = vld [vmem:[%s430_s6 + $0x60] sm:$0xff]  ;;  %v143_v21 = vld [vmem:[%s430_s6 + $0x58] sm:$0xff] }
   0x7   :  { %100 = vmatpush.msra.mxu1 %v71_v9  ;;  %120 = vmatpush.msra.mxu2 %v72_v10  ;;  %v235_v17 = vld [vmem:[%s428_s3] ss:$0 sm:$0xff]  ;;  %v142_v22 = vld [vmem:[%s430_s6 + $0x50] sm:$0xff]  ;;  %v141_v23 = vld [vmem:[%s430_s6 + $0x48] sm:$0xff] }
   0x8   :  { %63 = vmatpush.msra.mxu0 %v36_v5  ;;  %153 = vmatpush.msra.mxu3 %v146_v14  ;;  %v140_v24 = vld [vmem:[%s430_s6 + $0x40] sm:$0xff]  ;;  %v139_v25 = vld [vmem:[%s430_s6 + $0x38] sm:$0xff]  ;;  %v138_v26 = vld [vmem:[%s430_s6 + $0x30] sm:$0xff] }
   0x9   :  { %230 = vmatmul.msk.f32.vlgmr.msra.gmra.mxu0 %vm44_vm0, %v35_v6  ;;  %101 = vmatpush.msra.mxu1 %v69_v11  ;;  %v137_v27 = vld [vmem:[%s430_s6 + $0x28] sm:$0xff]  ;;  %v136_v28 = vld [vmem:[%s430_s6 + $0x20] sm:$0xff]  ;;  %v135_v29 = vld [vmem:[%s430_s6 + $0x18] sm:$0xff] }
   0xa   :  { %121 = vmatpush.msra.mxu2 %v70_v12  ;;  %154 = vmatpush.msra.mxu3 %v145_v15  ;;  %v134_v30 = vld [vmem:[%s430_s6 + $0x10] sm:$0xff]  ;;  %v133_v31 = vld [vmem:[%s430_s6 + $0x8] sm:$0xff]  ;;  %v132_v32 = vld [vmem:[%s430_s6] sm:$0xff] }
   0xb   :  { %v176_v33 = vld [vmem:[%s432_s8 + $0x18] sm:$0xff]  ;;  %v175_v34 = vld [vmem:[%s432_s8 + $0x10] sm:$0xff]  ;;  %v77_v35 = vld [vmem:[%s433_s5] sm:$0x3] }
   0xc   :  { %155 = vmatpush.msra.mxu3 %v144_v16  ;;  %196 = vmatpush.msrb.mxu0 %v176_v33  ;;  %v79_v36 = vperm.slane %v77_v35, 0  ;;  %v80_v39 = vperm.slane %v77_v35, 1  ;;  %v129_v44 = vld [vmem:[%s435_s1] sm:$0xff]  ;;  %v174_v48 = vld [vmem:[%s432_s8 + $0x8] sm:$0xff] }
   0xd   :  { %v173_v49 = vld [vmem:[%s432_s8] sm:$0xff] }
   0xe   :  { %156 = vmatpush.msra.mxu3 %v143_v21  ;;  %197 = vmatpush.msrb.mxu0 %v175_v34  ;;  %v236_v50 = vld [vmem:[%s431_s7] ss:$0 sm:$0xff] }
   0xf   :  { %v237_v54 = vld [vmem:[%s436_s9] ss:$0 sm:$0xff] }
  0x10   :  { %157 = vmatpush.msra.mxu3 %v142_v22  ;;  %198 = vmatpush.msrb.mxu0 %v174_v48 }
  0x12   :  { %158 = vmatpush.msra.mxu3 %v141_v23  ;;  %199 = vmatpush.msrb.mxu0 %v173_v49 }
  0x14   :  { %159 = vmatpush.msra.mxu3 %v140_v24 }
  0x16   :  { %160 = vmatpush.msra.mxu3 %v139_v25 }
  0x18   :  { %161 = vmatpush.msra.mxu3 %v138_v26 }
  0x1a   :  { %162 = vmatpush.msra.mxu3 %v137_v27 }
  0x1c   :  { %163 = vmatpush.msra.mxu3 %v136_v28 }
  0x1e   :  { %164 = vmatpush.msra.mxu3 %v135_v29 }
  0x20   :  { %165 = vmatpush.msra.mxu3 %v134_v30 }
  0x22   :  { %166 = vmatpush.msra.mxu3 %v133_v31 }
  0x24   :  { %167 = vmatpush.msra.mxu3 %v132_v32 }
  0x86   :  { %v65_v18 = vpop.f32.mrf.mxu0 }
  0x87   :  { %v66_v19 = vadd.f32 %v235_v17, %v65_v18 }
  0x89   :  { %v68_v20 = vmax.f32 %v66_v19, 0.0 }
  0x8b   :  { %231 = vmatmul.msk.f32.vlgmr.msra.gmra.mxu1 %vm44_vm0, %v68_v20  ;;  %232 = vmatmul.msk.f32.vlgmr.msra.gmra.mxu2 %vm44_vm0, %v68_v20 }
 0x108   :  { %v103_v37 = vpop.f32.mrf.mxu1 }
 0x109   :  { %v104_v38 = vadd.f32 %v103_v37, %v79_v36 }
 0x10b   :  { %224 = vst [vmem:[%s434_s10 + $0x8] sm:$0xff] %v104_v38 }
 0x10e   :  { %v123_v40 = vpop.f32.mrf.mxu2 }
 0x10f   :  { %v124_v41 = vadd.f32 %v123_v40, %v80_v39 }
 0x111   :  { %v126_v42 = vmul.f32 0.5, %v124_v41  ;;  %225 = vst [vmem:[%s434_s10 + $0x10] sm:$0xff] %v124_v41 }
 0x113   :  { %v127_v43 = vmul.f32 1.442695, %v126_v42 }
 0x115   :  { %238 = vpow2.f32 %v127_v43 }
 0x11b   :  { %v239_v45 = vpop.eup %238 }
 0x11c   :  { %v130_v46 = vmul.f32 %v239_v45, %v129_v44 }
 0x11e   :  { %v131_v47 = vadd.f32 %v130_v46, %v104_v38 }
 0x120   :  { %168 = vmatmul.f32.vlgmr.msra.gmra.mxu3 %v131_v47 }
 0x1a3   :  { %v169_v51 = vpop.f32.mrf.mxu3 }
 0x1a4   :  { %v170_v52 = vadd.f32 %v236_v50, %v169_v51 }
 0x1a6   :  { %v172_v53 = vmax.f32 %v170_v52, 0.0 }
 0x1a8   :  { %233 = vmatmul.msk.f32.vlgmr.msrb.gmra.mxu0 %vm44_vm0, %v172_v53 }
 0x225   :  { %v201_v55 = vpop.f32.mrf.mxu0 }
 0x226   :  { %v202_v56 = vadd.f32 %v237_v54, %v201_v55 }
 0x228   :  { %v234_v57 = vmul.f32 -1.442695, %v202_v56 }
 0x22a   :  { %240 = vpow2.f32 %v234_v57 }
 0x230   :  { %v241_v58 = vpop.eup %240 }
 0x231   :  { %v207_v59 = vadd.f32 1.0, %v241_v58 }
 0x233   :  { %242 = vrcp.f32 %v207_v59  ;;  %v219_v63 = vand.u32 2147483648, %v207_v59  ;;  %v217_v1 = vand.u32 2147483647, %v207_v59  ;;  %vm213_vm2 = vweird.f32 %v207_v59 }
 0x235   :  { %v220_v3 = vor.u32 1.1754944e-38, %v219_v63  ;;  %vm218_vm4 = vcmp.eq.f32.partialorder %v217_v1, 8.507059e+37 }
 0x239   :  { %v243_v60 = vpop.eup %242 }
 0x23a   :  { %v209_v61 = vmul.f32 %v243_v60, %v207_v59  ;;  %vm214_vm1 = vweird.f32 %v243_v60 }
 0x23b   :  { %vm215_vm3 = vmor %vm213_vm2, %vm214_vm1 }
 0x23c   :  { %v210_v62 = vsub.f32 1.0, %v209_v61 }
 0x23e   :  { %v211_v0 = vmul.f32 %v243_v60, %v210_v62 }
 0x240   :  { %v212_v2 = vadd.f32 %v243_v60, %v211_v0 }
 0x242   :  { %v216_v4 = vsel %vm215_vm3, %v243_v60, %v212_v2 }
 0x243   :  { %v221_v5 = vsel %vm218_vm4, %v220_v3, %v216_v4 }
 0x244   :  { %223 = vst [vmem:[%s434_s10] sm:$0xff] %v221_v5 }

</bundles_post_ra>
